<compile_context>
chip_gen: v7x
topology: tpu7x:2x2x1
jax: 0.10.0
libtpu: 0.0.40
codegen_flags: <defaults>
</compile_context>

<pallas_src>
import functools

import jax
import jax.numpy as jnp
from jax import lax
from jax.experimental import pallas as pl
from jax.experimental.pallas import tpu as pltpu

LN_EPS = 1e-5  # torch nn.LayerNorm default


def _round_up(x, m):
    return ((x + m - 1) // m) * m


def _vmem_capacity_bytes():
    """Per-core VMEM capacity; conservative 64 MiB (v7x) fallback."""
    try:
        cap = int(pltpu.get_tpu_info().vmem_capacity_bytes)
        if cap > 0:
            return cap
    except Exception:
        pass
    return 64 * 1024 * 1024


_VMEM_CAP = _vmem_capacity_bytes()
# Scoped VMEM limit for the kernels (leave headroom below physical capacity).
_VMEM_LIMIT = min(_VMEM_CAP - 8 * 1024 * 1024, 100 * 1024 * 1024)
# Budget used when sizing tiles (double buffers + scratch + temporaries).
_TILE_BUDGET = (_VMEM_LIMIT * 3) // 4


def _pick_tile_n(H, D):
    """Lane-dense output-column tile; cap so the double-buffered bf16 weight
    tile stays a modest fraction of the VMEM budget."""
    tn = min(512, _round_up(H, 128))
    while tn > 128 and 2 * D * tn * 2 > _TILE_BUDGET // 4:
        tn //= 2
    return tn


def _pick_tile_m(R, D, tile_n, x_bytes, out_bytes):
    """Row tile: as large as the VMEM budget allows (the weight stream is
    re-read R/tile_m times, so bigger tile_m = higher FLOP/byte on weights).
    128 MiB parts (v5e/v6e) get up to 1024 rows, 64 MiB parts (v7x) up to 512."""
    tm_cap = 1024 if _TILE_BUDGET >= 64 * 1024 * 1024 else 512
    tm = min(tm_cap, _round_up(R, 8))

    def need(t):
        return (2 * t * D * x_bytes            # x tile (double-buffered)
                + t * D * 2                    # bf16 LN scratch (single)
                + 3 * t * D * 4                # f32 LN temporaries headroom
                + 2 * D * tile_n * 2           # weight tile (double-buffered)
                + 2 * t * tile_n * out_bytes   # output tile (double-buffered)
                + 4 * D * 4 + 2 * tile_n * 4)  # gamma/beta/bias

    while tm > 8 and need(tm) > _TILE_BUDGET:
        tm = max(8, (tm // 2 // 8) * 8)
    return tm


# ---------------------- fused PreNorm + Linear kernel -----------------------
def _prenorm_linear_kernel(x_ref, g_ref, b_ref, w_ref, bias_ref, o_ref, y_ref,
                           *, matmul_dtype):
    # LayerNorm + affine + cast runs ONCE per row tile (at the first output-
    # column step) and is cached in the VMEM scratch y_ref; every subsequent
    # j step is MXU-only work from the scratch.
    @pl.when(pl.program_id(1) == 0)
    def _():
        x = x_ref[...].astype(jnp.float32)                 # (tile_m, D)
        mean = jnp.mean(x, axis=-1, keepdims=True)
        xc = x - mean
        var = jnp.mean(xc * xc, axis=-1, keepdims=True)    # two-pass: stable
        inv = lax.rsqrt(var + LN_EPS)
        y = xc * inv * g_ref[...] + b_ref[...]             # affine (gamma, beta)
        y_ref[...] = y.astype(matmul_dtype)

    # MXU matmul: bf16 operands, f32 accumulation.
    acc = jnp.dot(y_ref[...], w_ref[...], preferred_element_type=jnp.float32)
    o_ref[...] = (acc + bias_ref[...]).astype(o_ref.dtype)


def prepare_prenorm_linear_params(gamma, beta, w, bias, *,
                                  matmul_dtype=jnp.bfloat16):
    """One-time parameter preprocessing (hoisted out of the per-call path):
    bf16 weight cast, lane padding of W / bias, gamma/beta reshape+cast."""
    D, H = w.shape
    tile_n = _pick_tile_n(H, D)
    H_pad = _round_up(H, tile_n)

    w_p = w.astype(matmul_dtype)
    b_p = bias.reshape(1, H).astype(jnp.float32)
    if H_pad != H:
        w_p = jnp.pad(w_p, ((0, 0), (0, H_pad - H)))
        b_p = jnp.pad(b_p, ((0, 0), (0, H_pad - H)))

    return dict(
        gamma=gamma.reshape(1, D).astype(jnp.float32),
        beta=beta.reshape(1, D).astype(jnp.float32),
        w=w_p, bias=b_p,
        tile_n=tile_n, D=D, H=H, H_pad=H_pad,
        matmul_dtype=matmul_dtype,
    )


def prenorm_linear_apply(x, params):
    """Fused PreNorm + Linear: (fn = Linear(D, H))(LayerNorm(x)).

    `params` comes from prepare_prenorm_linear_params (call it once, reuse it
    across forwards)."""
    g2, be2 = params["gamma"], params["beta"]
    w_p, b_p = params["w"], params["bias"]
    tile_n, D, H, H_pad = params["tile_n"], params["D"], params["H"], params["H_pad"]
    matmul_dtype = params["matmul_dtype"]

    orig_shape = x.shape
    assert orig_shape[-1] == D
    x2 = x.reshape(-1, D)
    R = x2.shape[0]

    tile_m = _pick_tile_m(R, D, tile_n, x2.dtype.itemsize,
                          jnp.dtype(x.dtype).itemsize)
    R_pad = _round_up(R, tile_m)
    if R_pad != R:                      # pad only when not already aligned
        x2 = jnp.pad(x2, ((0, R_pad - R), (0, 0)))

    kernel = functools.partial(_prenorm_linear_kernel, matmul_dtype=matmul_dtype)

    out = pl.pallas_call(
        kernel,
        out_shape=jax.ShapeDtypeStruct((R_pad, H_pad), x.dtype),
        grid_spec=pltpu.PrefetchScalarGridSpec(
            num_scalar_prefetch=0,
            grid=(R_pad // tile_m, H_pad // tile_n),     # j (columns) innermost
            in_specs=[
                pl.BlockSpec((tile_m, D), lambda i, j: (i, 0)),   # x rows (revisited)
                pl.BlockSpec((1, D), lambda i, j: (0, 0)),        # gamma
                pl.BlockSpec((1, D), lambda i, j: (0, 0)),        # beta
                pl.BlockSpec((D, tile_n), lambda i, j: (0, j)),   # weight columns
                pl.BlockSpec((1, tile_n), lambda i, j: (0, j)),   # bias columns
            ],
            out_specs=pl.BlockSpec((tile_m, tile_n), lambda i, j: (i, j)),
            scratch_shapes=[pltpu.VMEM((tile_m, D), matmul_dtype)],  # LN cache
        ),
        compiler_params=pltpu.CompilerParams(
            # i stays "parallel" (rows shard across v7x's 2 TCs); j is the
            # inner "arbitrary" revisit axis for the LN scratch.
            dimension_semantics=("parallel", "arbitrary"),
            vmem_limit_bytes=_VMEM_LIMIT),
    )(x2, g2, be2, w_p, b_p)

    if R_pad != R or H_pad != H:
        out = out[:R, :H]
    return out.reshape(orig_shape[:-1] + (H,))


def prenorm_linear_pallas(x, gamma, beta, w, bias, *, matmul_dtype=jnp.bfloat16):
    """Convenience wrapper.  Prefer prepare_prenorm_linear_params + apply so
    the parameter prep is not repeated every forward."""
    return prenorm_linear_apply(
        x, prepare_prenorm_linear_params(gamma, beta, w, bias,
                                         matmul_dtype=matmul_dtype))


# ----------------------- standalone LayerNorm kernel ------------------------
def _layernorm_kernel(x_ref, g_ref, b_ref, o_ref):
    x = x_ref[...].astype(jnp.float32)                     # (tile_rows, D)
    mean = jnp.mean(x, axis=-1, keepdims=True)
    xc = x - mean
    var = jnp.mean(xc * xc, axis=-1, keepdims=True)        # two-pass: stable
    inv = lax.rsqrt(var + LN_EPS)
    o_ref[...] = (xc * inv * g_ref[...] + b_ref[...]).astype(o_ref.dtype)


def layernorm_pallas(x, gamma, beta, *, tile_rows=1024):
    """LayerNorm over the last axis of x (any leading dims).

    Keeps x's dtype end-to-end (compute in f32); HBM-bound, so row tiles are
    as large as the VMEM budget allows.  Used for PreNorm with an arbitrary
    `fn`; when `fn` is a Linear prefer the fused path."""
    orig_shape = x.shape
    D = orig_shape[-1]
    x2 = x.reshape(-1, D)
    R = x2.shape[0]

    per_row = D * (4 * x2.dtype.itemsize + 4)   # dbl-buffered in+out + f32 temp
    max_rows = max(8, (_TILE_BUDGET // per_row // 8) * 8)
    tile_rows = min(tile_rows, max_rows, _round_up(R, 8))
    R_pad = _round_up(R, tile_rows)
    if R_pad != R:
        x2 = jnp.pad(x2, ((0, R_pad - R), (0, 0)))

    g2 = gamma.reshape(1, D).astype(jnp.float32)
    b2 = beta.reshape(1, D).astype(jnp.float32)

    out = pl.pallas_call(
        _layernorm_kernel,
        out_shape=jax.ShapeDtypeStruct((R_pad, D), x.dtype),
        grid_spec=pltpu.PrefetchScalarGridSpec(
            num_scalar_prefetch=0,
            grid=(R_pad // tile_rows,),
            in_specs=[
                pl.BlockSpec((tile_rows, D), lambda i: (i, 0)),
                pl.BlockSpec((1, D), lambda i: (0, 0)),
                pl.BlockSpec((1, D), lambda i: (0, 0)),
            ],
            out_specs=pl.BlockSpec((tile_rows, D), lambda i: (i, 0)),
        ),
        compiler_params=pltpu.CompilerParams(
            dimension_semantics=("parallel",),
            vmem_limit_bytes=_VMEM_LIMIT),
    )(x2, g2, b2)
    if R_pad != R:
        out = out[:R]
    return out.reshape(orig_shape)


# --------------------------------- PreNorm -----------------------------------
def prenorm(x, gamma, beta, fn, **kwargs):
    """PreNorm.forward for an arbitrary fn: fn(LayerNorm(x), **kwargs)."""
    return fn(layernorm_pallas(x, gamma, beta), **kwargs)


if __name__ == "__main__":
    key = jax.random.PRNGKey(0)
    B, N, D, H = 2, 8, 32, 64   # batch, tokens, embed dim, fn hidden dim

    kx, kw, kb = jax.random.split(key, 3)
    x = jax.random.normal(kx, (B, N, D), dtype=jnp.float32)

    # nn.LayerNorm(dim) deterministic init: weight=1, bias=0.
    gamma = jnp.ones((D,), dtype=jnp.float32)
    beta = jnp.zeros((D,), dtype=jnp.float32)

    # Deterministic params for the demo fn (a Linear D -> H).
    w = jax.random.normal(kw, (D, H), dtype=jnp.float32) * 0.02
    b_lin = jax.random.normal(kb, (H,), dtype=jnp.float32) * 0.02

    # Plain-JAX reference.
    mean = jnp.mean(x, axis=-1, keepdims=True)
    var = jnp.mean((x - mean) ** 2, axis=-1, keepdims=True)
    y_ref = (x - mean) / jnp.sqrt(var + LN_EPS) * gamma + beta
    out_ref = y_ref @ w + b_lin

    # 1) Standalone LayerNorm kernel (general PreNorm path), f32 throughout.
    y_ln = layernorm_pallas(x, gamma, beta)
    jax.block_until_ready(y_ln)
    assert y_ln.shape == x.shape
    assert jnp.allclose(y_ln, y_ref, atol=1e-4, rtol=1e-4)

    # 1b) General PreNorm path with an arbitrary fn (LN kernel + plain JAX fn).
    out_gen = prenorm(x, gamma, beta, lambda y: y @ w + b_lin)
    jax.block_until_ready(out_gen)
    assert out_gen.shape == (B, N, H)
    assert jnp.allclose(out_gen, out_ref, atol=1e-3, rtol=1e-3)

    # 2) Fused PreNorm + Linear kernel (params prepared once, reused).
    #    bf16 MXU operands + f32 accumulation => not bit-identical to the f32
    #    reference; tolerance reflects that.
    params = prepare_prenorm_linear_params(gamma, beta, w, b_lin)
    params = jax.tree_util.tree_map(
        lambda v: jax.block_until_ready(v) if isinstance(v, jax.Array) else v,
        params)
    out = prenorm_linear_apply(x, params)
    jax.block_until_ready(out)
    assert out.shape == (B, N, H)
    assert jnp.allclose(out, out_ref, atol=2e-2, rtol=2e-2)

    # Convenience one-shot wrapper also works.
    out2 = prenorm_linear_pallas(x, gamma, beta, w, b_lin)
    jax.block_until_ready(out2)
    assert jnp.allclose(out2, out_ref, atol=2e-2, rtol=2e-2)

    print("KERNEL_OK")
</pallas_src>

<mosaic_0001>
module attributes {stable_mosaic.version = 11 : i64} {
  func.func @_layernorm_kernel(%arg0: i32, %arg1: memref<16x32xf32, #tpu.memory_space<vmem>>, %arg2: memref<1x32xf32, #tpu.memory_space<vmem>>, %arg3: memref<1x32xf32, #tpu.memory_space<vmem>>, %arg4: memref<16x32xf32, #tpu.memory_space<vmem>>) attributes {dimension_semantics = [#tpu.dimension_semantics<parallel>], iteration_bounds = array<i64: 1>, scalar_prefetch = 0 : i64, scratch_operands = 0 : i64, tpu.core_type = #tpu.core_type<tc>, window_params = [{transform_indices = @transform_0, window_bounds = array<i64: 16, 32>}, {pipeline_mode = #tpu.pipeline_mode<synchronous>, transform_indices = @transform_1, window_bounds = array<i64: 1, 32>}, {pipeline_mode = #tpu.pipeline_mode<synchronous>, transform_indices = @transform_2, window_bounds = array<i64: 1, 32>}, {transform_indices = @transform_3, window_bounds = array<i64: 16, 32>}]} {
    %c0 = arith.constant 0 : index
    %c0_0 = arith.constant 0 : index
    %0 = vector.load %arg1[%c0, %c0_0] : memref<16x32xf32, #tpu.memory_space<vmem>>, vector<16x32xf32>
    %cst = arith.constant dense<0.000000e+00> : vector<16xf32>
    %1 = vector.multi_reduction <add>, %0, %cst [1] : vector<16x32xf32> to vector<16xf32>
    %2 = vector.shape_cast %1 : vector<16xf32> to vector<16x1xf32>
    %cst_1 = arith.constant 3.200000e+01 : f32
    %3 = vector.broadcast %cst_1 : f32 to vector<16x1xf32>
    %4 = arith.divf %2, %3 : vector<16x1xf32>
    %5 = vector.broadcast %4 : vector<16x1xf32> to vector<16x32xf32>
    %6 = arith.subf %0, %5 : vector<16x32xf32>
    %7 = arith.mulf %6, %6 : vector<16x32xf32>
    %cst_2 = arith.constant dense<0.000000e+00> : vector<16xf32>
    %8 = vector.multi_reduction <add>, %7, %cst_2 [1] : vector<16x32xf32> to vector<16xf32>
    %9 = vector.shape_cast %8 : vector<16xf32> to vector<16x1xf32>
    %cst_3 = arith.constant 3.200000e+01 : f32
    %10 = vector.broadcast %cst_3 : f32 to vector<16x1xf32>
    %11 = arith.divf %9, %10 : vector<16x1xf32>
    %cst_4 = arith.constant 9.99999974E-6 : f32
    %12 = vector.broadcast %cst_4 : f32 to vector<16x1xf32>
    %13 = arith.addf %11, %12 : vector<16x1xf32>
    %14 = math.rsqrt %13 : vector<16x1xf32>
    %15 = vector.broadcast %14 : vector<16x1xf32> to vector<16x32xf32>
    %16 = arith.mulf %6, %15 : vector<16x32xf32>
    %c0_5 = arith.constant 0 : index
    %c0_6 = arith.constant 0 : index
    %17 = vector.load %arg2[%c0_5, %c0_6] : memref<1x32xf32, #tpu.memory_space<vmem>>, vector<1x32xf32>
    %18 = vector.broadcast %17 : vector<1x32xf32> to vector<16x32xf32>
    %19 = arith.mulf %16, %18 : vector<16x32xf32>
    %c0_7 = arith.constant 0 : index
    %c0_8 = arith.constant 0 : index
    %20 = vector.load %arg3[%c0_7, %c0_8] : memref<1x32xf32, #tpu.memory_space<vmem>>, vector<1x32xf32>
    %21 = vector.broadcast %20 : vector<1x32xf32> to vector<16x32xf32>
    %22 = arith.addf %19, %21 : vector<16x32xf32>
    %c0_9 = arith.constant 0 : index
    %c0_10 = arith.constant 0 : index
    %23 = vector.load %arg4[%c0_9, %c0_10] : memref<16x32xf32, #tpu.memory_space<vmem>>, vector<16x32xf32>
    tpu.vector_store %arg4[%c0_9, %c0_10], %22 {strides = array<i32>} : memref<16x32xf32, #tpu.memory_space<vmem>>, vector<16x32xf32>,
    return
  }
  func.func @transform_0(%arg0: i32) -> (i32, i32) {
    %c0_i32 = arith.constant 0 : i32
    %c0_i32_0 = arith.constant 0 : i32
    return %arg0, %c0_i32 : i32, i32
  }
  func.func @transform_1(%arg0: i32) -> (i32, i32) {
    %c0_i32 = arith.constant 0 : i32
    %c0_i32_0 = arith.constant 0 : i32
    %c0_i32_1 = arith.constant 0 : i32
    return %c0_i32, %c0_i32_0 : i32, i32
  }
  func.func @transform_2(%arg0: i32) -> (i32, i32) {
    %c0_i32 = arith.constant 0 : i32
    %c0_i32_0 = arith.constant 0 : i32
    %c0_i32_1 = arith.constant 0 : i32
    return %c0_i32, %c0_i32_0 : i32, i32
  }
  func.func @transform_3(%arg0: i32) -> (i32, i32) {
    %c0_i32 = arith.constant 0 : i32
    %c0_i32_0 = arith.constant 0 : i32
    return %arg0, %c0_i32 : i32, i32
  }
}

</mosaic_0001>

<bundles_post_ra>
// kernel: tpu_custom_call.1
= control target key start
LH: loop header
LB: loop body
LE: loop exit
PB: predicated region body
PF: predicated region fallthrough
CT: control target
= control target key end

     0   :  { %8 = vsyncpa [#allocation3], 0  ;;  %s220_s0 = inlined_call_operand.hbm [shape: f32[16,32], index: 0, kind: input, shape index: {}]   ;;  %s221_s1 = inlined_call_operand.vmem [shape: f32[1,32], index: 1, kind: input, shape index: {}]   ;;  %s222_s2 = inlined_call_operand.vmem [shape: f32[1,32], index: 2, kind: input, shape index: {}]   ;;  %s223_s3 = inlined_call_operand.hbm [shape: f32[16,32], index: 3, kind: output, shape index: {}]  }
   0x1   :  { %9 = vsyncpa [#allocation4], 0  ;;  %s154_s12 = smov [#allocation2]   ;;  %s106_s16 = scalar_lea.hbm %s220_s0, 256 }
   0x2   :  { %s15_s13 = sshll.u32 %s154_s12, 4  ;;  %p107_p0 = scmp.ne.s32.totalorder %s220_s0, %s106_s16  ;;  %s16_s13 = int_to_ptr.vmem [resolvable:$true] %s15_s13 }
   0x3   :  { %p110_p1 = scmp.lt.u32.totalorder %s106_s16, %s220_s0 }
   0x5   :  { %p112_p2 = pnand %p110_p1, %p107_p0 }
   0x7   :  { %115 = shalt.err (!%p112_p2)
}
   0x8   :  { %s116_s21 = scalar_lea.vmem %s16_s13, 256  ;;  %p121_p4 = scmp.lt.s32.totalorder %s16_s13, %s16_s13 }
   0x9   :  { %p117_p3 = scmp.ne.s32.totalorder %s16_s13, %s116_s21  ;;  %p122_p5 = scmp.lt.s32.totalorder %s116_s21, %s116_s21 }
   0xb   :  { %p123_p6 = por %p122_p5, %p121_p4 }
   0xd   :  { %p124_p7 = pnand %p123_p6, %p117_p3 }
   0xf   :  { %127 = shalt.err (!%p124_p7)
}
  0x10   :  { %s155_s22 = smov 128   ;;  %s156_s23 = smov 8  }
  0x11   :  { %21 = dma.hbm_to_vmem [thread:$0]  %s220_s0, 256, %s16_s13, [#allocation3], %s155_s22, %s155_s22, %s156_s23  }
  0x12   :  { %150 = dma.done.wait [#allocation3], 256  }
  0x13   :  { %151 = vsyncadd [#allocation3], 4294967040  ;;  %vm31_vm0 = vcmask 261120   ;;  %v29_v0 = vld [vmem:[#allocation2] sm:$0xff]  ;;  %v30_v1 = vld [vmem:[#allocation2 + $0x8] sm:$0xff]  ;;  %s157_s29 = smov [#allocation5]  }
  0x14   :  { %v32_v2 = vsel %vm31_vm0, %v29_v0, 0.0  ;;  %v35_v3 = vsel %vm31_vm0, %v30_v1, 0.0  ;;  %v96_v21 = vld [vmem:[%s221_s1] ss:$0 sm:$0xff]  ;;  %s84_s30 = sshll.u32 %s157_s29, 4  ;;  %s85_s30 = int_to_ptr.vmem [resolvable:$true] %s84_s30 }
  0x15   :  { %33 = vadd.xlane.f32.xlu0 %v32_v2  ;;  %v97_v23 = vld [vmem:[%s222_s2] ss:$0 sm:$0xff]  ;;  %s128_s4 = scalar_lea.vmem %s85_s30, 256  ;;  %p133_p9 = scmp.lt.s32.totalorder %s85_s30, %s85_s30 }
  0x16   :  { %p129_p8 = scmp.ne.s32.totalorder %s85_s30, %s128_s4  ;;  %p134_p10 = scmp.lt.s32.totalorder %s128_s4, %s128_s4 }
  0x18   :  { %p135_p11 = por %p134_p10, %p133_p9 }
  0x19   :  { %36 = vadd.xlane.f32.xlu0 %v35_v3 }
  0x1a   :  { %p136_p12 = pnand %p135_p11, %p129_p8 }
  0xa2   :  { %v34_v4 = vpop.xlane.xlu0 %33 }
  0xa3   :  { %v39_v5 = vmul.f32 0.03125, %v34_v4 }
  0xa5   :  { %v41_v6 = vsub.f32 %v29_v0, %v39_v5 }
  0xa6   :  { %v37_v7 = vpop.xlane.xlu0 %36 }
  0xa7   :  { %v40_v8 = vmul.f32 0.03125, %v37_v7  ;;  %v43_v9 = vmul.f32 %v41_v6, %v41_v6 }
  0xa9   :  { %v42_v10 = vsub.f32 %v30_v1, %v40_v8  ;;  %v45_v11 = vsel %vm31_vm0, %v43_v9, 0.0 }
  0xaa   :  { %46 = vadd.xlane.f32.xlu1 %v45_v11 }
  0xab   :  { %v44_v12 = vmul.f32 %v42_v10, %v42_v10 }
  0xad   :  { %v48_v13 = vsel %vm31_vm0, %v44_v12, 0.0 }
  0xae   :  { %49 = vadd.xlane.f32.xlu1 %v48_v13 }
 0x137   :  { %v47_v14 = vpop.xlane.xlu1 %46 }
 0x138   :  { %v51_v15 = vmul.f32 0.03125, %v47_v14 }
 0x13a   :  { %v53_v16 = vadd.f32 1e-05, %v51_v15 }
 0x13b   :  { %v50_v17 = vpop.xlane.xlu1 %49 }
 0x13c   :  { %102 = vrsqrt.f32 %v53_v16  ;;  %v52_v18 = vmul.f32 0.03125, %v50_v17 }
 0x13e   :  { %v54_v19 = vadd.f32 1e-05, %v52_v18 }
 0x140   :  { %104 = vrsqrt.f32 %v54_v19 }
 0x146   :  { %v103_v20 = vpop.eup %102 }
 0x147   :  { %v57_v22 = vmul.f32 %v103_v20, %v41_v6 }
 0x149   :  { %v66_v24 = vmul.f32 %v96_v21, %v57_v22 }
 0x14a   :  { %v105_v25 = vpop.eup %104 }
 0x14b   :  { %v58_v26 = vmul.f32 %v105_v25, %v42_v10  ;;  %v75_v27 = vadd.f32 %v97_v23, %v66_v24 }
 0x14d   :  { %v67_v28 = vmul.f32 %v96_v21, %v58_v26  ;;  %77 = vst.msk [vmem:[#allocation5] sm:$0xff] %vm31_vm0, %v75_v27 }
 0x14f   :  { %v76_v29 = vadd.f32 %v97_v23, %v67_v28 }
 0x151   :  { %78 = vst.msk [vmem:[#allocation5 + $0x8] sm:$0xff] %vm31_vm0, %v76_v29 }
 0x152   :  { %139 = shalt.err (!%p136_p12)
}
 0x153   :  { %s140_s5 = scalar_lea.hbm %s223_s3, 256 }
 0x154   :  { %p141_p13 = scmp.ne.s32.totalorder %s223_s3, %s140_s5  ;;  %p144_p0 = scmp.lt.u32.totalorder %s140_s5, %s223_s3 }
 0x156   :  { %p146_p1 = pnand %p144_p0, %p141_p13 }
 0x158   :  { %149 = shalt.err (!%p146_p1)
}
 0x159   :  { %90 = dma.vmem_to_hbm [thread:$0]  %s85_s30, 256, %s223_s3, [#allocation4], %s155_s22, %s155_s22, %s156_s23  }
 0x15a   :  { %152 = dma.done.wait [#allocation4], 256  }
 0x15b   :  { %153 = vsyncadd [#allocation4], 4294967040 }
 0x15c   :  { %94 = vsyncpa [#allocation3], 1 }
 0x15d   :  { %95 = vsyncpa [#allocation4], 1 }

</bundles_post_ra>
